<compile_context>
chip_gen: v7x
topology: tpu7x:2x2x1
jax: 0.10.0
libtpu: 0.0.40
codegen_flags: <defaults>
</compile_context>

<pallas_src>
import jax
import jax.numpy as jnp
from jax.experimental import pallas as pl
from jax.experimental.pallas import tpu as pltpu


def classifier_kernel(x_ref, w_ref, b_ref, o_ref):
    # Linear: (TB, 465) @ (465, 128) + (1, 128). MXU with f32 accumulation;
    # Mosaic pads the 465-wide contraction internally.
    logits = jnp.dot(x_ref[...], w_ref[...],
                     preferred_element_type=jnp.float32) + b_ref[...]
    # Numerically stable softmax over the lane-dense class axis. Padded class
    # lanes carry a -1e30 bias => exp underflows to exactly 0 in f32, so this
    # equals softmax over the real 10 classes. Garbage rows in a ragged last
    # batch block stay confined to their own row and are never stored.
    m = jnp.max(logits, axis=-1, keepdims=True)
    e = jnp.exp(logits - m)
    s = jnp.sum(e, axis=-1, keepdims=True)
    o_ref[...] = (e * pl.reciprocal(s, approx=False)).astype(o_ref.dtype)


def _round_up(n, m):
    return ((n + m - 1) // m) * m


def pad_classifier_params(w, b):
    """One-time parameter prep (do NOT call per forward pass).

    w: (465, 10) f32 (in_features, out_features), b: (1, 10) f32.
    Returns lane-dense padded (465, 128) weight, (1, 128) bias with -1e30 on
    padded class lanes, and the real class count.
    """
    f_in, n_cls = w.shape
    o_pad = _round_up(n_cls, 128)
    wp = jnp.zeros((f_in, o_pad), w.dtype).at[:, :n_cls].set(w)
    bp = jnp.full((1, o_pad), -1e30, jnp.float32).at[:, :n_cls].set(
        b.astype(jnp.float32))
    return wp, bp, n_cls


def classifier_forward(x, wp, bp, n_classes, *, tb=1024):
    """x: (B, 465) f32; wp/bp from pad_classifier_params -> (B, n_classes)."""
    B, F = x.shape
    Fw, O_pad = wp.shape
    assert Fw == F and O_pad % 128 == 0 and bp.shape == (1, O_pad)

    if B <= 256:
        # Single tile covering the whole batch: block dims equal the full
        # array dims, so any B (even not a multiple of 8) is legal.
        TB = B
    else:
        # At least 2 grid steps (sharded across TensorCores on v7x via the
        # "parallel" semantic), TB a multiple of 8 for sublane alignment,
        # capped at `tb` to bound the per-tile VMEM footprint.
        TB = min(_round_up(tb, 8), _round_up(pl.cdiv(B, 2), 8))

    grid = (pl.cdiv(B, TB),)

    out = pl.pallas_call(
        classifier_kernel,
        out_shape=jax.ShapeDtypeStruct((B, O_pad), x.dtype),
        grid=grid,
        in_specs=[
            # x: batch-tiled, K unpadded (465 == full array dim).
            pl.BlockSpec((TB, F), lambda i: (i, 0)),
            # Weight / bias: VMEM-resident across all grid steps.
            pl.BlockSpec((Fw, O_pad), lambda i: (0, 0)),
            pl.BlockSpec((1, O_pad), lambda i: (0, 0)),
        ],
        out_specs=pl.BlockSpec((TB, O_pad), lambda i: (i, 0)),
        compiler_params=pltpu.CompilerParams(
            dimension_semantics=("parallel",)),
    )(x, wp, bp)

    # Strip the lane padding on the class axis.
    return out[:, :n_classes]


def init_linear(key, fan_in, fan_out):
    """PyTorch nn.Linear default init: U(-1/sqrt(fan_in), 1/sqrt(fan_in))."""
    kw, kb = jax.random.split(key)
    bound = 1.0 / jnp.sqrt(jnp.float32(fan_in))
    w = jax.random.uniform(kw, (fan_in, fan_out), jnp.float32, -bound, bound)
    b = jax.random.uniform(kb, (1, fan_out), jnp.float32, -bound, bound)
    return w, b


if __name__ == "__main__":
    key = jax.random.PRNGKey(0)
    k_x, k_x_big, k_nn3, k_nn4 = jax.random.split(key, 4)

    # Parameters (deterministic init, no checkpoint).
    w3, b3 = init_linear(k_nn3, 465, 10)   # nn3 — used in forward
    w4, b4 = init_linear(k_nn4, 100, 10)   # nn4 — defined but unused in forward

    # One-time parameter prep (hoisted out of the forward path).
    w3p, b3p, n_cls = pad_classifier_params(w3, b3)

    # Small-batch case (matches the module's typical usage): single-tile path.
    B = 4
    x = jax.random.normal(k_x, (B, 465), jnp.float32)
    out = jax.block_until_ready(classifier_forward(x, w3p, b3p, n_cls))
    ref = jax.nn.softmax(x @ w3 + b3, axis=1)
    assert out.shape == (B, 10)
    assert jnp.allclose(out, ref, atol=1e-5, rtol=1e-5)
    assert jnp.allclose(jnp.sum(out, axis=1), 1.0, atol=1e-5)

    # Larger ragged batch exercises the multi-step cdiv grid (TB=304, grid=2,
    # partial last block) and the unpadded-K / lane-dense output path.
    B_big = 600
    x_big = jax.random.normal(k_x_big, (B_big, 465), jnp.float32)
    out_big = jax.block_until_ready(classifier_forward(x_big, w3p, b3p, n_cls))
    ref_big = jax.nn.softmax(x_big @ w3 + b3, axis=1)
    assert out_big.shape == (B_big, 10)
    assert jnp.allclose(out_big, ref_big, atol=1e-5, rtol=1e-5)
    assert jnp.allclose(jnp.sum(out_big, axis=1), 1.0, atol=1e-5)

    print("KERNEL_OK")
</pallas_src>

<mosaic_0001>
module attributes {stable_mosaic.version = 11 : i64} {
  func.func @classifier_kernel(%arg0: i32, %arg1: memref<4x465xf32, #tpu.memory_space<vmem>>, %arg2: memref<465x128xf32, #tpu.memory_space<vmem>>, %arg3: memref<1x128xf32, #tpu.memory_space<vmem>>, %arg4: memref<4x128xf32, #tpu.memory_space<vmem>>) attributes {dimension_semantics = [#tpu.dimension_semantics<parallel>], iteration_bounds = array<i64: 1>, scalar_prefetch = 0 : i64, scratch_operands = 0 : i64, tpu.core_type = #tpu.core_type<tc>, window_params = [{transform_indices = @transform_0, window_bounds = array<i64: 4, 465>}, {pipeline_mode = #tpu.pipeline_mode<synchronous>, transform_indices = @transform_1, window_bounds = array<i64: 465, 128>}, {pipeline_mode = #tpu.pipeline_mode<synchronous>, transform_indices = @transform_2, window_bounds = array<i64: 1, 128>}, {transform_indices = @transform_3, window_bounds = array<i64: 4, 128>}]} {
    %c0 = arith.constant 0 : index
    %c0_0 = arith.constant 0 : index
    %0 = vector.load %arg1[%c0, %c0_0] : memref<4x465xf32, #tpu.memory_space<vmem>>, vector<4x465xf32>
    %c0_1 = arith.constant 0 : index
    %c0_2 = arith.constant 0 : index
    %1 = vector.load %arg2[%c0_1, %c0_2] : memref<465x128xf32, #tpu.memory_space<vmem>>, vector<465x128xf32>
    %cst = arith.constant dense<0.000000e+00> : vector<4x128xf32>
    %2 = tpu.matmul %0, %1, %cst {dimension_numbers = #tpu.dot_dimension_numbers<[1], [0], [0], [1], [0, 0, 1, 1], [], []>} : vector<4x465xf32>, vector<465x128xf32>, vector<4x128xf32> -> vector<4x128xf32>
    %c0_3 = arith.constant 0 : index
    %c0_4 = arith.constant 0 : index
    %3 = vector.load %arg3[%c0_3, %c0_4] : memref<1x128xf32, #tpu.memory_space<vmem>>, vector<1x128xf32>
    %4 = vector.broadcast %3 : vector<1x128xf32> to vector<4x128xf32>
    %5 = arith.addf %2, %4 : vector<4x128xf32>
    %cst_5 = arith.constant dense<0xFF800000> : vector<4xf32>
    %6 = vector.multi_reduction <maximumf>, %5, %cst_5 [1] : vector<4x128xf32> to vector<4xf32>
    %7 = vector.shape_cast %6 : vector<4xf32> to vector<4x1xf32>
    %8 = vector.broadcast %7 : vector<4x1xf32> to vector<4x128xf32>
    %9 = arith.subf %5, %8 : vector<4x128xf32>
    %10 = math.exp %9 : vector<4x128xf32>
    %cst_6 = arith.constant dense<0.000000e+00> : vector<4xf32>
    %11 = vector.multi_reduction <add>, %10, %cst_6 [1] : vector<4x128xf32> to vector<4xf32>
    %12 = vector.shape_cast %11 : vector<4xf32> to vector<4x1xf32>
    %13 = tpu.reciprocal %12 : vector<4x1xf32> -> vector<4x1xf32>
    %14 = vector.broadcast %13 : vector<4x1xf32> to vector<4x128xf32>
    %15 = arith.mulf %10, %14 : vector<4x128xf32>
    %c0_7 = arith.constant 0 : index
    %c0_8 = arith.constant 0 : index
    %16 = vector.load %arg4[%c0_7, %c0_8] : memref<4x128xf32, #tpu.memory_space<vmem>>, vector<4x128xf32>
    tpu.vector_store %arg4[%c0_7, %c0_8], %15 {strides = array<i32>} : memref<4x128xf32, #tpu.memory_space<vmem>>, vector<4x128xf32>,
    return
  }
  func.func @transform_0(%arg0: i32) -> (i32, i32) {
    %c0_i32 = arith.constant 0 : i32
    %c0_i32_0 = arith.constant 0 : i32
    return %arg0, %c0_i32 : i32, i32
  }
  func.func @transform_1(%arg0: i32) -> (i32, i32) {
    %c0_i32 = arith.constant 0 : i32
    %c0_i32_0 = arith.constant 0 : i32
    %c0_i32_1 = arith.constant 0 : i32
    return %c0_i32, %c0_i32_0 : i32, i32
  }
  func.func @transform_2(%arg0: i32) -> (i32, i32) {
    %c0_i32 = arith.constant 0 : i32
    %c0_i32_0 = arith.constant 0 : i32
    %c0_i32_1 = arith.constant 0 : i32
    return %c0_i32, %c0_i32_0 : i32, i32
  }
  func.func @transform_3(%arg0: i32) -> (i32, i32) {
    %c0_i32 = arith.constant 0 : i32
    %c0_i32_0 = arith.constant 0 : i32
    return %arg0, %c0_i32 : i32, i32
  }
}

</mosaic_0001>

<bundles_post_ra>
// kernel: tpu_custom_call.1
= control target key start
LH: loop header
LB: loop body
LE: loop exit
PB: predicated region body
PF: predicated region fallthrough
CT: control target
= control target key end

     0   :  { %8 = vsyncpa [#allocation3], 0  ;;  %s575_s0 = inlined_call_operand.hbm [shape: f32[4,465], index: 0, kind: input, shape index: {}]   ;;  %s576_s1 = inlined_call_operand.hbm [shape: f32[465,128], index: 1, kind: input, shape index: {}]   ;;  %s577_s2 = inlined_call_operand.vmem [shape: f32[1,128], index: 2, kind: input, shape index: {}]   ;;  %s578_s3 = inlined_call_operand.hbm [shape: f32[4,128], index: 3, kind: output, shape index: {}]  }
   0x1   :  { %9 = vsyncpa [#allocation6], 0 }
   0x2   :  { %10 = vsyncpa [#allocation4], 0  ;;  %s484_s12 = smov [#allocation2]   ;;  %s485_s14 = smov [#allocation5]  }
   0x3   :  { %s17_s13 = sshll.u32 %s484_s12, 4  ;;  %s26_s15 = sshll.u32 %s485_s14, 4  ;;  %s18_s13 = int_to_ptr.vmem [resolvable:$true] %s17_s13  ;;  %s511_s15 = int_to_ptr.vmem [resolvable:$true] %s26_s15 }
   0x4   :  { %s412_s18 = scalar_lea.hbm %s575_s0, 256 }
   0x5   :  { %p413_p0 = scmp.ne.s32.totalorder %s575_s0, %s412_s18  ;;  %p416_p1 = scmp.lt.u32.totalorder %s412_s18, %s575_s0 }
   0x7   :  { %p418_p2 = pnand %p416_p1, %p413_p0 }
   0x9   :  { %421 = shalt.err (!%p418_p2)
}
   0xa   :  { %s422_s23 = scalar_lea.vmem %s18_s13, 256  ;;  %p427_p4 = scmp.lt.s32.totalorder %s18_s13, %s18_s13 }
   0xb   :  { %p423_p3 = scmp.ne.s32.totalorder %s18_s13, %s422_s23  ;;  %p428_p5 = scmp.lt.s32.totalorder %s422_s23, %s422_s23 }
   0xd   :  { %p429_p6 = por %p428_p5, %p427_p4 }
   0xf   :  { %p430_p7 = pnand %p429_p6, %p423_p3 }
  0x11   :  { %433 = shalt.err (!%p430_p7)
}
  0x12   :  { %20 = dma.hbm_to_vmem [thread:$0]  %s575_s0, 256, %s18_s13, [#allocation3]  }
  0x13   :  { %s434_s28 = scalar_lea.hbm %s576_s1, 7552 }
  0x14   :  { %p435_p8 = scmp.ne.s32.totalorder %s576_s1, %s434_s28  ;;  %p438_p9 = scmp.lt.u32.totalorder %s434_s28, %s576_s1 }
  0x16   :  { %p440_p10 = pnand %p438_p9, %p435_p8 }
  0x18   :  { %443 = shalt.err (!%p440_p10)
}
  0x19   :  { %s444_s6 = scalar_lea.vmem %s511_s15, 7552  ;;  %p449_p12 = scmp.lt.s32.totalorder %s511_s15, %s511_s15 }
  0x1a   :  { %p445_p11 = scmp.ne.s32.totalorder %s511_s15, %s444_s6  ;;  %p450_p13 = scmp.lt.s32.totalorder %s444_s6, %s444_s6 }
  0x1c   :  { %p451_p0 = por %p450_p13, %p449_p12 }
  0x1e   :  { %p452_p1 = pnand %p451_p0, %p445_p11 }
  0x20   :  { %455 = shalt.err (!%p452_p1)
}
  0x21   :  { %s486_s0 = smov 128   ;;  %s487_s7 = smov 8  }
  0x22   :  { %32 = dma.hbm_to_vmem [thread:$0]  %s576_s1, 7552, %s511_s15, [#allocation6], %s486_s0, %s486_s0, %s487_s7  }
  0x23   :  { %478 = dma.done.wait [#allocation3], 256  }
  0x24   :  { %479 = vsyncadd [#allocation3], 4294967040 }
  0x25   :  { %480 = dma.done.wait [#allocation6], 7552  }
  0x26   :  { %481 = vsyncadd [#allocation6], 4294959744  ;;  %v488_v0 = vmov 0.0|0.0   ;;  %v75_v1 = vld [vmem:[#allocation5 + $0x100] sm:$0xff]  ;;  %v76_v2 = vld [vmem:[#allocation5 + $0x108] sm:$0xff]  ;;  %vm114_vm0 = vcmask 662528  }
  0x27   :  { %360 = vmatprep.subr.bf16.mxu1 %v488_v0  ;;  %v77_v3 = vld [vmem:[#allocation5 + $0x110] sm:$0xff]  ;;  %v361_v4 = vpack.c.bf16 %v76_v2, %v75_v1  ;;  %v78_v5 = vld [vmem:[#allocation5 + $0x118] sm:$0xff]  ;;  %v59_v6 = vld [vmem:[#allocation5 + $0x80] sm:$0xff]  ;;  %vm117_vm1 = vcmask 1040384   ;;  %vm261_vm2 = vcmask 1043456   ;;  %s490_s11 = smov [#allocation7]  }
  0x28   :  { %v364_v7 = vpack.c.bf16 %v78_v5, %v77_v3  ;;  %v60_v8 = vld [vmem:[#allocation5 + $0x88] sm:$0xff]  ;;  %v43_v9 = vld [vmem:[#allocation5] sm:$0xff]  ;;  %v61_v15 = vld [vmem:[#allocation5 + $0x90] sm:$0xff]  ;;  %s280_s12 = sshll.u32 %s490_s11, 4  ;;  %s281_s12 = int_to_ptr.vmem [resolvable:$true] %s280_s12 }
  0x29   :  { %362 = vmatpush1.bf16.msra.mxu1 %v361_v4  ;;  %v44_v10 = vld [vmem:[#allocation5 + $0x8] sm:$0xff]  ;;  %v79_v11 = vld [vmem:[#allocation5 + $0x120] sm:$0xff]  ;;  %v328_v13 = vpack.c.bf16 %v60_v8, %v59_v6  ;;  %v62_v16 = vld [vmem:[#allocation5 + $0x98] sm:$0xff]  ;;  %p461_p3 = scmp.lt.s32.totalorder %s281_s12, %s281_s12 }
  0x2a   :  { %363 = vmatprep.subr.bf16.mxu1 %v488_v0  ;;  %v80_v12 = vld [vmem:[#allocation5 + $0x128] sm:$0xff]  ;;  %v330_v14 = vpack.c.bf16 %v44_v10, %v43_v9  ;;  %v45_v17 = vld [vmem:[#allocation5 + $0x10] sm:$0xff]  ;;  %v46_v18 = vld [vmem:[#allocation5 + $0x18] sm:$0xff]  ;;  %v332_v19 = vpack.c.bf16 %v62_v16, %v61_v15 }
  0x2b   :  { %329 = vmatprep.subr.bf16.mxu0 %v328_v13  ;;  %v63_v20 = vld [vmem:[#allocation5 + $0xa0] sm:$0xff]  ;;  %v367_v21 = vpack.c.bf16 %v80_v12, %v79_v11  ;;  %v81_v22 = vld [vmem:[#allocation5 + $0x130] sm:$0xff]  ;;  %v334_v23 = vpack.c.bf16 %v46_v18, %v45_v17  ;;  %v64_v24 = vld [vmem:[#allocation5 + $0xa8] sm:$0xff] }
  0x2c   :  { %331 = vmatpush3.bf16.msra.mxu0 %v330_v14  ;;  %v82_v25 = vld [vmem:[#allocation5 + $0x138] sm:$0xff]  ;;  %v336_v26 = vpack.c.bf16 %v64_v24, %v63_v20  ;;  %v47_v27 = vld [vmem:[#allocation5 + $0x20] sm:$0xff]  ;;  %v48_v28 = vld [vmem:[#allocation5 + $0x28] sm:$0xff] }
  0x2d   :  { %365 = vmatpush1.bf16.msra.mxu1 %v364_v7  ;;  %333 = vmatprep.subr.bf16.mxu0 %v332_v19  ;;  %v65_v29 = vld [vmem:[#allocation5 + $0xb0] sm:$0xff]  ;;  %v66_v30 = vld [vmem:[#allocation5 + $0xb8] sm:$0xff]  ;;  %v370_v31 = vpack.c.bf16 %v82_v25, %v81_v22  ;;  %v83_v32 = vld [vmem:[#allocation5 + $0x140] sm:$0xff]  ;;  %v338_v33 = vpack.c.bf16 %v48_v28, %v47_v27 }
  0x2e   :  { %366 = vmatprep.subr.bf16.mxu1 %v488_v0  ;;  %v84_v34 = vld [vmem:[#allocation5 + $0x148] sm:$0xff]  ;;  %v340_v35 = vpack.c.bf16 %v66_v30, %v65_v29  ;;  %v49_v36 = vld [vmem:[#allocation5 + $0x30] sm:$0xff]  ;;  %v50_v37 = vld [vmem:[#allocation5 + $0x38] sm:$0xff]  ;;  %v489_v29 = vmov 0.0  }
  0x2f   :  { %v67_v38 = vld [vmem:[#allocation5 + $0xc0] sm:$0xff]  ;;  %v68_v39 = vld [vmem:[#allocation5 + $0xc8] sm:$0xff]  ;;  %v373_v40 = vpack.c.bf16 %v84_v34, %v83_v32  ;;  %v85_v41 = vld [vmem:[#allocation5 + $0x150] sm:$0xff]  ;;  %v342_v42 = vpack.c.bf16 %v50_v37, %v49_v36 }
  0x30   :  { %335 = vmatpush3.bf16.msra.mxu0 %v334_v23  ;;  %v86_v43 = vld [vmem:[#allocation5 + $0x158] sm:$0xff]  ;;  %v344_v44 = vpack.c.bf16 %v68_v39, %v67_v38  ;;  %v51_v45 = vld [vmem:[#allocation5 + $0x40] sm:$0xff]  ;;  %v52_v46 = vld [vmem:[#allocation5 + $0x48] sm:$0xff] }
  0x31   :  { %368 = vmatpush1.bf16.msra.mxu1 %v367_v21  ;;  %337 = vmatprep.subr.bf16.mxu0 %v336_v26  ;;  %v69_v47 = vld [vmem:[#allocation5 + $0xd0] sm:$0xff]  ;;  %v70_v48 = vld [vmem:[#allocation5 + $0xd8] sm:$0xff]  ;;  %v376_v50 = vpack.c.bf16 %v86_v43, %v85_v41  ;;  %v87_v51 = vld [vmem:[#allocation5 + $0x160] sm:$0xff]  ;;  %v346_v53 = vpack.c.bf16 %v52_v46, %v51_v45 }
  0x32   :  { %369 = vmatprep.subr.bf16.mxu1 %v488_v0  ;;  %v41_v49 = vld [vmem:[#allocation2] sm:$0xff]  ;;  %v88_v52 = vld [vmem:[#allocation5 + $0x168] sm:$0xff]  ;;  %v348_v55 = vpack.c.bf16 %v70_v48, %v69_v47  ;;  %v54_v57 = vld [vmem:[#allocation5 + $0x58] sm:$0xff] }
  0x33   :  { %v111_v54 = vcombine.high %v41_v49, %v41_v49  ;;  %v53_v56 = vld [vmem:[#allocation5 + $0x50] sm:$0xff]  ;;  %v548_v58 = vld [vmem:[#allocation2 + $0x8] sm:$0xff]  ;;  %v71_v59 = vld [vmem:[#allocation5 + $0xe0] sm:$0xff]  ;;  %v379_v62 = vpack.c.bf16 %v88_v52, %v87_v51 }
  0x34   :  { %339 = vmatpush3.bf16.msra.mxu0 %v338_v33  ;;  %v72_v60 = vld [vmem:[#allocation5 + $0xe8] sm:$0xff]  ;;  %v112_v61 = vcombine.high %v548_v58, %v548_v58  ;;  %v89_v63 = vld [vmem:[#allocation5 + $0x170] sm:$0xff]  ;;  %v350_v1 = vpack.c.bf16 %v54_v57, %v53_v56  ;;  %v90_v2 = vld [vmem:[#allocation5 + $0x178] sm:$0xff] }
  0x35   :  { %371 = vmatpush1.bf16.msra.mxu1 %v370_v31  ;;  %341 = vmatprep.subr.bf16.mxu0 %v340_v35  ;;  %v352_v3 = vpack.c.bf16 %v72_v60, %v71_v59  ;;  %v55_v4 = vld [vmem:[#allocation5 + $0x60] sm:$0xff]  ;;  %v56_v5 = vld [vmem:[#allocation5 + $0x68] sm:$0xff]  ;;  %v73_v6 = vld [vmem:[#allocation5 + $0xf0] sm:$0xff]  ;;  %v382_v8 = vpack.c.bf16 %v90_v2, %v89_v63 }
  0x36   :  { %372 = vmatprep.subr.bf16.mxu1 %v488_v0  ;;  %185 = vmatprep.mubr.f32.mxu0 %v111_v54  ;;  %v74_v7 = vld [vmem:[#allocation5 + $0xf8] sm:$0xff]  ;;  %v91_v9 = vld [vmem:[#allocation5 + $0x180] sm:$0xff]  ;;  %v354_v10 = vpack.c.bf16 %v56_v5, %v55_v4  ;;  %v92_v11 = vld [vmem:[#allocation5 + $0x188] sm:$0xff] }
  0x37   :  { %292 = vmatprep.mubr.msk.f32.mxu1 %vm114_vm0, %v112_v61  ;;  %v356_v12 = vpack.c.bf16 %v74_v7, %v73_v6  ;;  %v57_v13 = vld [vmem:[#allocation5 + $0x70] sm:$0xff]  ;;  %v58_v14 = vld [vmem:[#allocation5 + $0x78] sm:$0xff]  ;;  %v385_v15 = vpack.c.bf16 %v92_v11, %v91_v9  ;;  %v95_v20 = vld [vmem:[#allocation5 + $0x1a0] sm:$0xff] }
  0x38   :  { %343 = vmatpush3.bf16.msra.mxu0 %v342_v42  ;;  %v358_v16 = vpack.c.bf16 %v58_v14, %v57_v13  ;;  %v93_v17 = vld [vmem:[#allocation5 + $0x190] sm:$0xff]  ;;  %v94_v18 = vld [vmem:[#allocation5 + $0x198] sm:$0xff]  ;;  %v96_v21 = vld [vmem:[#allocation5 + $0x1a8] sm:$0xff] }
  0x39   :  { %374 = vmatpush1.bf16.msra.mxu1 %v373_v40  ;;  %345 = vmatprep.subr.bf16.mxu0 %v344_v44  ;;  %v388_v19 = vpack.c.bf16 %v94_v18, %v93_v17  ;;  %v391_v22 = vpack.c.bf16 %v96_v21, %v95_v20  ;;  %v97_v23 = vld [vmem:[#allocation5 + $0x1b0] sm:$0xff]  ;;  %v98_v24 = vld [vmem:[#allocation5 + $0x1b8] sm:$0xff]  ;;  %v99_v26 = vld [vmem:[#allocation5 + $0x1c0] sm:$0xff] }
  0x3a   :  { %375 = vmatprep.subr.bf16.mxu1 %v488_v0  ;;  %v394_v25 = vpack.c.bf16 %v98_v24, %v97_v23  ;;  %v100_v27 = vld [vmem:[#allocation5 + $0x1c8] sm:$0xff]  ;;  %v101_v30 = vld [vmem:[#allocation5 + $0x1d0] sm:$0x1] }
  0x3b   :  { %v397_v28 = vpack.c.bf16 %v100_v27, %v99_v26  ;;  %v290_v34 = vld [vmem:[%s577_s2] ss:$0 sm:$0xff]  ;;  %s456_s2 = scalar_lea.vmem %s281_s12, 64 }
  0x3c   :  { %347 = vmatpush3.bf16.msra.mxu0 %v346_v53  ;;  %p457_p2 = scmp.ne.s32.totalorder %s281_s12, %s456_s2  ;;  %p462_p4 = scmp.lt.s32.totalorder %s456_s2, %s456_s2 }
  0x3d   :  { %377 = vmatpush1.bf16.msra.mxu1 %v376_v50  ;;  %349 = vmatprep.subr.bf16.mxu0 %v348_v55 }
  0x3e   :  { %378 = vmatprep.subr.bf16.mxu1 %v488_v0  ;;  %p463_p5 = por %p462_p4, %p461_p3 }
  0x40   :  { %351 = vmatpush3.bf16.msra.mxu0 %v350_v1  ;;  %p464_p6 = pnand %p463_p5, %p457_p2 }
  0x41   :  { %380 = vmatpush1.bf16.msra.mxu1 %v379_v62  ;;  %353 = vmatprep.subr.bf16.mxu0 %v352_v3 }
  0x42   :  { %381 = vmatprep.subr.bf16.mxu1 %v488_v0 }
  0x44   :  { %355 = vmatpush3.bf16.msra.mxu0 %v354_v10 }
  0x45   :  { %383 = vmatpush1.bf16.msra.mxu1 %v382_v8  ;;  %357 = vmatprep.subr.bf16.mxu0 %v356_v12 }
  0x46   :  { %384 = vmatprep.subr.bf16.mxu1 %v488_v0 }
  0x48   :  { %359 = vmatpush3.bf16.msra.mxu0 %v358_v16 }
  0x49   :  { %386 = vmatpush1.bf16.msra.mxu1 %v385_v15 }
  0x4a   :  { %387 = vmatprep.subr.bf16.mxu1 %v488_v0 }
  0x4b   :  { %186 = vmatmul.mubr.f32.vlgmr.msra.gmra.mrb[0].mxu0 %v41_v49 }
  0x4d   :  { %389 = vmatpush1.bf16.msra.mxu1 %v388_v19 }
  0x4e   :  { %390 = vmatprep.subr.bf16.mxu1 %v488_v0 }
  0x51   :  { %392 = vmatpush1.bf16.msra.mxu1 %v391_v22 }
  0x52   :  { %393 = vmatprep.subr.bf16.mxu1 %v488_v0 }
  0x55   :  { %395 = vmatpush1.bf16.msra.mxu1 %v394_v25 }
  0x56   :  { %396 = vmatprep.subr.bf16.mxu1 %v488_v0 }
  0x59   :  { %398 = vmatpush1.bf16.msra.mxu1 %v397_v28 }
  0x5a   :  { %243 = vmatprep.subr.mxu1 %v489_v29 }
  0x5d   :  { %291 = vmatpush1.msk.msra.mxu1 %vm117_vm1, %v101_v30 }
  0x5e   :  { %256 = vmatmul.mubr.f32.vlgmr.msra.gmra.mrb[0].mxu1 %v548_v58 }
 0x11e   :  { %v325_v31 = vpop.f32.mrb[0].mxu0 }
 0x11f   :  { %v326_v32 = vpop.f32.mrb[1].mxu0 }
 0x120   :  { %v327_v33 = vadd.f32 %v326_v32, %v325_v31 }
 0x122   :  { %v188_v35 = vadd.f32 %v327_v33, %v290_v34 }
 0x131   :  { %v257_v36 = vpop.f32.mrb[0].mxu1 }
 0x132   :  { %v258_v37 = vadd.f32 %v257_v36, %v188_v35  ;;  %v259_v0 = vpop.f32.mrb[1].mxu1 }
 0x134   :  { %v262_v38 = vsel %vm261_vm2, %v258_v37, -inf }
 0x135   :  { %263 = vmax.xlane.f32.xlu0 %v262_v38 }
 0x1c2   :  { %v264_v39 = vpop.xlane.xlu0 %263 }
 0x1c3   :  { %v265_v40 = vsub.f32 %v258_v37, %v264_v39 }
 0x1c5   :  { %v266_v41 = vmul.f32 1.442695, %v265_v40 }
 0x1c7   :  { %408 = vpow2.f32 %v266_v41 }
 0x1d1   :  { %v409_v42 = vpop.eup %408 }
 0x1d2   :  { %v268_v43 = vsel %vm261_vm2, %v409_v42, 0.0 }
 0x1d3   :  { %269 = vadd.xlane.f32.xlu0 %v268_v43 }
 0x260   :  { %v270_v44 = vpop.xlane.xlu0 %269 }
 0x261   :  { %410 = vrcp.f32 %v270_v44 }
 0x26b   :  { %v411_v45 = vpop.eup %410 }
 0x26c   :  { %v272_v46 = vmul.f32 %v411_v45, %v409_v42 }
 0x26e   :  { %273 = vst [vmem:[#allocation7] sm:$0xf] %v272_v46 }
 0x26f   :  { %467 = shalt.err (!%p464_p6)
}
 0x270   :  { %s468_s15 = scalar_lea.hbm %s578_s3, 64 }
 0x271   :  { %p469_p7 = scmp.ne.s32.totalorder %s578_s3, %s468_s15  ;;  %p472_p8 = scmp.lt.u32.totalorder %s468_s15, %s578_s3 }
 0x273   :  { %p474_p9 = pnand %p472_p8, %p469_p7 }
 0x275   :  { %477 = shalt.err (!%p474_p9)
}
 0x276   :  { %283 = dma.vmem_to_hbm [thread:$0]  %s281_s12, 64, %s578_s3, [#allocation4]  }
 0x277   :  { %482 = dma.done.wait [#allocation4], 64  }
 0x278   :  { %483 = vsyncadd [#allocation4], 4294967232 }
 0x279   :  { %287 = vsyncpa [#allocation3], 1 }
 0x27a   :  { %288 = vsyncpa [#allocation6], 1 }
 0x27b   :  { %289 = vsyncpa [#allocation4], 1 }

</bundles_post_ra>
